<compile_context>
chip_gen: v7x
topology: tpu7x:2x2x1
jax: 0.10.0
libtpu: 0.0.40
codegen_flags: <defaults>
</compile_context>

<pallas_src>
import math

import jax
import jax.numpy as jnp
from jax import lax
from jax.experimental import pallas as pl
from jax.experimental.pallas import tpu as pltpu

NEG_SLOPE = 0.01          # LeakyReLU slope used by the PyTorch module
NUM_CLASSES = 3
PAD_CLASSES = 8           # final-layer rows zero-padded to a full sublane group


def _leaky_relu(x):
    return jnp.where(x >= 0, x, NEG_SLOPE * x)


def _round_up(x, m):
    return (x + m - 1) // m * m


def _tpu_generation():
    try:
        kind = jax.devices()[0].device_kind.lower()
    except Exception:
        return 0
    if "v7" in kind or "tpu7" in kind:
        return 7
    if "v6" in kind:
        return 6
    if "v5" in kind:
        return 5
    return 0


def wesadnn_kernel(x_ref, w1_ref, b1_ref, w2_ref, b2_ref, w3_ref, b3_ref, out_ref):
    # x_ref: (TB, NI) f32 natural layout; weights (out, in) bf16; biases (out, 1) f32.
    x = x_ref[...].astype(jnp.bfloat16)                      # (TB, NI)

    # Layer 1: contract NI against NI -> (F1, TB).  The MXU produces the
    # transposed-activation layout directly; x^T is never materialized.
    h = lax.dot_general(w1_ref[...], x, (((1,), (1,)), ((), ())),
                        preferred_element_type=jnp.float32)
    h = _leaky_relu(h + b1_ref[...]).astype(jnp.bfloat16)    # Dropout == identity (eval)

    # Layer 2: Linear + Dropout(identity) + LeakyReLU
    h = jnp.dot(w2_ref[...], h, preferred_element_type=jnp.float32) + b2_ref[...]
    h = _leaky_relu(h).astype(jnp.bfloat16)                  # (F2, TB)

    # Final Linear (rows zero-padded to PAD_CLASSES purely for alignment).
    logits_p = jnp.dot(w3_ref[...], h, preferred_element_type=jnp.float32) + b3_ref[...]
    logits = logits_p[:NUM_CLASSES, :]                       # (3, TB)

    # Softmax over the 3 real class rows; exact divide so each column sums to 1.
    m = jnp.max(logits, axis=0, keepdims=True)
    e = jnp.exp(logits - m)
    probs = e / jnp.sum(e, axis=0, keepdims=True)

    # Single packed, lane-dense output: rows 0..2 = logits^T, rows 3..5 = probs^T.
    out_ref[0:NUM_CLASSES, :] = logits
    out_ref[NUM_CLASSES:2 * NUM_CLASSES, :] = probs


def wesadnn_forward(x, params, *, tile_b=None):
    """x: (B, num_inputs) float.  params in PyTorch layout:
       (w1 (F1,NI), b1 (F1,), w2 (F2,F1), b2 (F2,), w3 (3,F2), b3 (3,)).
       Returns (logits (B,3) f32, probs (B,3) f32)."""
    w1, b1, w2, b2, w3, b3 = params
    B, NI = x.shape
    F1 = w1.shape[0]
    F2 = w2.shape[0]

    # Generation-aware tiling: v7x has 64 MiB VMEM/TC and 2 TCs (smaller tile
    # cap, keep >=4 grid steps so the "parallel" axis feeds both cores);
    # v5e/v6e have 128 MiB physical VMEM, so push the tile much bigger under a
    # raised scoped-VMEM limit to amortize the ~0.35 us fixed per-step cost.
    gen = _tpu_generation()
    if tile_b is None:
        tile_b = 16384 if gen >= 7 else 32768
    min_steps = 4 if gen >= 7 else 2
    vmem_limit = (48 if gen >= 7 else 64) * 1024 * 1024

    target_steps = max(min_steps, pl.cdiv(B, tile_b))
    TB = min(tile_b, _round_up(pl.cdiv(B, target_steps), 128))
    if TB >= B:
        TB = B                      # one step covers the whole (small) batch
    grid = (pl.cdiv(B, TB),)        # ragged last block: OOB reads, masked stores

    # Tiny one-time prep (weights/biases only -- x is fed untouched, no extra
    # HBM pass over the batch).
    w1b = w1.astype(jnp.bfloat16)
    w2b = w2.astype(jnp.bfloat16)
    b1c = b1.reshape(F1, 1).astype(jnp.float32)
    b2c = b2.reshape(F2, 1).astype(jnp.float32)
    w3p = jnp.zeros((PAD_CLASSES, F2), jnp.bfloat16).at[:NUM_CLASSES].set(
        w3.astype(jnp.bfloat16))
    b3p = jnp.zeros((PAD_CLASSES, 1), jnp.float32).at[:NUM_CLASSES, 0].set(
        b3.astype(jnp.float32))

    resident = lambda i: (0, 0)      # weights/biases: single DMA, stay in VMEM

    in_specs = [
        pl.BlockSpec((TB, NI), lambda i: (i, 0)),       # x, natural layout
        pl.BlockSpec((F1, NI), resident),               # w1
        pl.BlockSpec((F1, 1), resident),                # b1
        pl.BlockSpec((F2, F1), resident),               # w2
        pl.BlockSpec((F2, 1), resident),                # b2
        pl.BlockSpec((PAD_CLASSES, F2), resident),      # w3 (zero-padded rows)
        pl.BlockSpec((PAD_CLASSES, 1), resident),       # b3 (zero-padded rows)
    ]
    out_specs = pl.BlockSpec((2 * NUM_CLASSES, TB), lambda i: (0, i))
    out_shape = jax.ShapeDtypeStruct((2 * NUM_CLASSES, B), jnp.float32)

    cost = pl.CostEstimate(
        flops=2 * B * (NI * F1 + F1 * F2 + F2 * PAD_CLASSES),
        transcendentals=B * NUM_CLASSES,
        bytes_accessed=(x.size * x.dtype.itemsize
                        + (w1b.size + w2b.size + w3p.size) * 2
                        + (b1c.size + b2c.size + b3p.size) * 4
                        + 2 * NUM_CLASSES * B * 4),
    )

    packed = pl.pallas_call(
        wesadnn_kernel,
        out_shape=out_shape,
        grid=grid,
        in_specs=in_specs,
        out_specs=out_specs,
        compiler_params=pltpu.CompilerParams(
            dimension_semantics=("parallel",),
            vmem_limit_bytes=vmem_limit,
        ),
        cost_estimate=cost,
    )(x, w1b, b1c, w2b, b2c, w3p, b3p)

    # Back to the PyTorch (B, 3) convention (tiny slice + transpose).
    logits = packed[:NUM_CLASSES, :].T
    probs = packed[NUM_CLASSES:, :].T
    return logits, probs


def init_linear(key, fan_in, fan_out):
    """Deterministic init mimicking PyTorch nn.Linear defaults (U(-k, k)).
       Weight is (out, in), bias is (out,) — PyTorch layout."""
    kw, kb = jax.random.split(key)
    bound = 1.0 / math.sqrt(fan_in)
    w = jax.random.uniform(kw, (fan_out, fan_in), jnp.float32, -bound, bound)
    b = jax.random.uniform(kb, (fan_out,), jnp.float32, -bound, bound)
    return w, b


def reference_forward(x, params):
    """Pure-JAX reference mirroring the kernel's bf16 rounding of x/weights/acts."""
    w1, b1, w2, b2, w3, b3 = params
    bf = lambda a: a.astype(jnp.bfloat16).astype(jnp.float32)
    h = _leaky_relu(bf(x) @ bf(w1).T + b1)
    h = _leaky_relu(bf(h) @ bf(w2).T + b2)
    logits = bf(h) @ bf(w3).T + b3
    return logits, jax.nn.softmax(logits, axis=-1)


if __name__ == "__main__":
    # Module config: num_inputs=16, first_layer_features=32, layer_scalings=[2]
    #   -> Linear(16,32)+LeakyReLU, Linear(32,16)+LeakyReLU, Linear(16,3)
    B, NUM_INPUTS, F1 = 8, 16, 32
    F2 = F1 // 2

    key = jax.random.PRNGKey(0)
    kx, k1, k2, k3 = jax.random.split(key, 4)

    x = jax.random.normal(kx, (B, NUM_INPUTS), jnp.float32)
    w1, b1 = init_linear(k1, NUM_INPUTS, F1)
    w2, b2 = init_linear(k2, F1, F2)
    w3, b3 = init_linear(k3, F2, NUM_CLASSES)
    params = (w1, b1, w2, b2, w3, b3)

    logits, probs = wesadnn_forward(x, params)
    jax.block_until_ready((logits, probs))

    ref_logits, ref_probs = reference_forward(x, params)
    assert logits.shape == (B, NUM_CLASSES) and probs.shape == (B, NUM_CLASSES)
    assert jnp.allclose(logits, ref_logits, atol=2e-3, rtol=2e-3)
    assert jnp.allclose(probs, ref_probs, atol=2e-3, rtol=2e-3)
    assert jnp.allclose(jnp.sum(probs, axis=-1), 1.0, atol=1e-3)

    print("KERNEL_OK")
</pallas_src>

<mosaic_0001>
module attributes {stable_mosaic.version = 11 : i64} {
  func.func @wesadnn_kernel(%arg0: i32, %arg1: memref<8x16xf32, #tpu.memory_space<vmem>>, %arg2: memref<32x16xbf16, #tpu.memory_space<vmem>>, %arg3: memref<32x1xf32, #tpu.memory_space<vmem>>, %arg4: memref<16x32xbf16, #tpu.memory_space<vmem>>, %arg5: memref<16x1xf32, #tpu.memory_space<vmem>>, %arg6: memref<8x16xbf16, #tpu.memory_space<vmem>>, %arg7: memref<8x1xf32, #tpu.memory_space<vmem>>, %arg8: memref<6x8xf32, #tpu.memory_space<vmem>>) attributes {dimension_semantics = [#tpu.dimension_semantics<parallel>], iteration_bounds = array<i64: 1>, scalar_prefetch = 0 : i64, scratch_operands = 0 : i64, tpu.core_type = #tpu.core_type<tc>, window_params = [{transform_indices = @transform_0, window_bounds = array<i64: 8, 16>}, {pipeline_mode = #tpu.pipeline_mode<synchronous>, transform_indices = @transform_1, window_bounds = array<i64: 32, 16>}, {pipeline_mode = #tpu.pipeline_mode<synchronous>, transform_indices = @transform_2, window_bounds = array<i64: 32, 1>}, {pipeline_mode = #tpu.pipeline_mode<synchronous>, transform_indices = @transform_3, window_bounds = array<i64: 16, 32>}, {pipeline_mode = #tpu.pipeline_mode<synchronous>, transform_indices = @transform_4, window_bounds = array<i64: 16, 1>}, {pipeline_mode = #tpu.pipeline_mode<synchronous>, transform_indices = @transform_5, window_bounds = array<i64: 8, 16>}, {pipeline_mode = #tpu.pipeline_mode<synchronous>, transform_indices = @transform_6, window_bounds = array<i64: 8, 1>}, {transform_indices = @transform_7, window_bounds = array<i64: 6, 8>}]} {
    %c0 = arith.constant 0 : index
    %c0_0 = arith.constant 0 : index
    %0 = vector.load %arg1[%c0, %c0_0] : memref<8x16xf32, #tpu.memory_space<vmem>>, vector<8x16xf32>
    %1 = arith.truncf %0 : vector<8x16xf32> to vector<8x16xbf16>
    %c0_1 = arith.constant 0 : index
    %c0_2 = arith.constant 0 : index
    %2 = vector.load %arg2[%c0_1, %c0_2] : memref<32x16xbf16, #tpu.memory_space<vmem>>, vector<32x16xbf16>
    %cst = arith.constant dense<0.000000e+00> : vector<32x8xf32>
    %3 = tpu.matmul %2, %1, %cst {dimension_numbers = #tpu.dot_dimension_numbers<[1], [1], [0], [0], [0, 0, 1, 0], [], []>} : vector<32x16xbf16>, vector<8x16xbf16>, vector<32x8xf32> -> vector<32x8xf32>
    %c0_3 = arith.constant 0 : index
    %c0_4 = arith.constant 0 : index
    %4 = vector.load %arg3[%c0_3, %c0_4] : memref<32x1xf32, #tpu.memory_space<vmem>>, vector<32x1xf32>
    %5 = vector.broadcast %4 : vector<32x1xf32> to vector<32x8xf32>
    %6 = arith.addf %3, %5 : vector<32x8xf32>
    %cst_5 = arith.constant 0.000000e+00 : f32
    %7 = vector.broadcast %cst_5 : f32 to vector<32x8xf32>
    %8 = arith.cmpf oge, %6, %7 : vector<32x8xf32>
    %cst_6 = arith.constant 0.00999999977 : f32
    %9 = vector.broadcast %cst_6 : f32 to vector<32x8xf32>
    %10 = arith.mulf %9, %6 : vector<32x8xf32>
    %11 = arith.select %8, %6, %10 : vector<32x8xi1>, vector<32x8xf32>
    %12 = arith.truncf %11 : vector<32x8xf32> to vector<32x8xbf16>
    %c0_7 = arith.constant 0 : index
    %c0_8 = arith.constant 0 : index
    %13 = vector.load %arg4[%c0_7, %c0_8] : memref<16x32xbf16, #tpu.memory_space<vmem>>, vector<16x32xbf16>
    %cst_9 = arith.constant dense<0.000000e+00> : vector<16x8xf32>
    %14 = tpu.matmul %13, %12, %cst_9 {dimension_numbers = #tpu.dot_dimension_numbers<[1], [0], [0], [1], [0, 0, 1, 1], [], []>} : vector<16x32xbf16>, vector<32x8xbf16>, vector<16x8xf32> -> vector<16x8xf32>
    %c0_10 = arith.constant 0 : index
    %c0_11 = arith.constant 0 : index
    %15 = vector.load %arg5[%c0_10, %c0_11] : memref<16x1xf32, #tpu.memory_space<vmem>>, vector<16x1xf32>
    %16 = vector.broadcast %15 : vector<16x1xf32> to vector<16x8xf32>
    %17 = arith.addf %14, %16 : vector<16x8xf32>
    %cst_12 = arith.constant 0.000000e+00 : f32
    %18 = vector.broadcast %cst_12 : f32 to vector<16x8xf32>
    %19 = arith.cmpf oge, %17, %18 : vector<16x8xf32>
    %cst_13 = arith.constant 0.00999999977 : f32
    %20 = vector.broadcast %cst_13 : f32 to vector<16x8xf32>
    %21 = arith.mulf %20, %17 : vector<16x8xf32>
    %22 = arith.select %19, %17, %21 : vector<16x8xi1>, vector<16x8xf32>
    %23 = arith.truncf %22 : vector<16x8xf32> to vector<16x8xbf16>
    %c0_14 = arith.constant 0 : index
    %c0_15 = arith.constant 0 : index
    %24 = vector.load %arg6[%c0_14, %c0_15] : memref<8x16xbf16, #tpu.memory_space<vmem>>, vector<8x16xbf16>
    %cst_16 = arith.constant dense<0.000000e+00> : vector<8x8xf32>
    %25 = tpu.matmul %24, %23, %cst_16 {dimension_numbers = #tpu.dot_dimension_numbers<[1], [0], [0], [1], [0, 0, 1, 1], [], []>} : vector<8x16xbf16>, vector<16x8xbf16>, vector<8x8xf32> -> vector<8x8xf32>
    %c0_17 = arith.constant 0 : index
    %c0_18 = arith.constant 0 : index
    %26 = vector.load %arg7[%c0_17, %c0_18] : memref<8x1xf32, #tpu.memory_space<vmem>>, vector<8x1xf32>
    %27 = vector.broadcast %26 : vector<8x1xf32> to vector<8x8xf32>
    %28 = arith.addf %25, %27 : vector<8x8xf32>
    %29 = vector.extract_strided_slice %28 {offsets = [0, 0], sizes = [3, 8], strides = [1, 1]} : vector<8x8xf32> to vector<3x8xf32>
    %cst_19 = arith.constant dense<0xFF800000> : vector<8xf32>
    %30 = vector.multi_reduction <maximumf>, %29, %cst_19 [0] : vector<3x8xf32> to vector<8xf32>
    %31 = vector.shape_cast %30 : vector<8xf32> to vector<1x8xf32>
    %32 = vector.broadcast %31 : vector<1x8xf32> to vector<3x8xf32>
    %33 = arith.subf %29, %32 : vector<3x8xf32>
    %34 = math.exp %33 : vector<3x8xf32>
    %cst_20 = arith.constant dense<0.000000e+00> : vector<8xf32>
    %35 = vector.multi_reduction <add>, %34, %cst_20 [0] : vector<3x8xf32> to vector<8xf32>
    %36 = vector.shape_cast %35 : vector<8xf32> to vector<1x8xf32>
    %37 = vector.broadcast %36 : vector<1x8xf32> to vector<3x8xf32>
    %38 = arith.divf %34, %37 : vector<3x8xf32>
    %c0_21 = arith.constant 0 : index
    %c0_22 = arith.constant 0 : index
    %39 = vector.load %arg8[%c0_21, %c0_22] : memref<6x8xf32, #tpu.memory_space<vmem>>, vector<3x8xf32>
    tpu.vector_store %arg8[%c0_21, %c0_22], %29 {strides = array<i32>} : memref<6x8xf32, #tpu.memory_space<vmem>>, vector<3x8xf32>,
    %c3 = arith.constant 3 : index
    %c0_23 = arith.constant 0 : index
    %40 = vector.load %arg8[%c3, %c0_23] : memref<6x8xf32, #tpu.memory_space<vmem>>, vector<3x8xf32>
    tpu.vector_store %arg8[%c3, %c0_23], %38 {strides = array<i32>} : memref<6x8xf32, #tpu.memory_space<vmem>>, vector<3x8xf32>,
    return
  }
  func.func @transform_0(%arg0: i32) -> (i32, i32) {
    %c0_i32 = arith.constant 0 : i32
    %c0_i32_0 = arith.constant 0 : i32
    return %arg0, %c0_i32 : i32, i32
  }
  func.func @transform_1(%arg0: i32) -> (i32, i32) {
    %c0_i32 = arith.constant 0 : i32
    %c0_i32_0 = arith.constant 0 : i32
    %c0_i32_1 = arith.constant 0 : i32
    return %c0_i32, %c0_i32_0 : i32, i32
  }
  func.func @transform_2(%arg0: i32) -> (i32, i32) {
    %c0_i32 = arith.constant 0 : i32
    %c0_i32_0 = arith.constant 0 : i32
    %c0_i32_1 = arith.constant 0 : i32
    return %c0_i32, %c0_i32_0 : i32, i32
  }
  func.func @transform_3(%arg0: i32) -> (i32, i32) {
    %c0_i32 = arith.constant 0 : i32
    %c0_i32_0 = arith.constant 0 : i32
    %c0_i32_1 = arith.constant 0 : i32
    return %c0_i32, %c0_i32_0 : i32, i32
  }
  func.func @transform_4(%arg0: i32) -> (i32, i32) {
    %c0_i32 = arith.constant 0 : i32
    %c0_i32_0 = arith.constant 0 : i32
    %c0_i32_1 = arith.constant 0 : i32
    return %c0_i32, %c0_i32_0 : i32, i32
  }
  func.func @transform_5(%arg0: i32) -> (i32, i32) {
    %c0_i32 = arith.constant 0 : i32
    %c0_i32_0 = arith.constant 0 : i32
    %c0_i32_1 = arith.constant 0 : i32
    return %c0_i32, %c0_i32_0 : i32, i32
  }
  func.func @transform_6(%arg0: i32) -> (i32, i32) {
    %c0_i32 = arith.constant 0 : i32
    %c0_i32_0 = arith.constant 0 : i32
    %c0_i32_1 = arith.constant 0 : i32
    return %c0_i32, %c0_i32_0 : i32, i32
  }
  func.func @transform_7(%arg0: i32) -> (i32, i32) {
    %c0_i32 = arith.constant 0 : i32
    %c0_i32_0 = arith.constant 0 : i32
    return %c0_i32, %arg0 : i32, i32
  }
}

</mosaic_0001>

<bundles_post_ra>
// kernel: tpu_custom_call.1
= control target key start
LH: loop header
LB: loop body
LE: loop exit
PB: predicated region body
PF: predicated region fallthrough
CT: control target
= control target key end

     0   :  { %12 = vsyncpa [#allocation3], 0  ;;  %s797_s0 = inlined_call_operand.hbm [shape: f32[8,16], index: 0, kind: input, shape index: {}]   ;;  %s798_s1 = inlined_call_operand.hbm [shape: bf16[32,16], index: 1, kind: input, shape index: {}]   ;;  %s799_s2 = inlined_call_operand.hbm [shape: f32[32,1], index: 2, kind: input, shape index: {}]   ;;  %s800_s3 = inlined_call_operand.hbm [shape: bf16[16,32], index: 3, kind: input, shape index: {}]   ;;  %s801_s4 = inlined_call_operand.hbm [shape: f32[16,1], index: 4, kind: input, shape index: {}]   ;;  %s802_s5 = inlined_call_operand.hbm [shape: bf16[8,16], index: 5, kind: input, shape index: {}]   ;;  %s803_s6 = inlined_call_operand.hbm [shape: f32[8,1], index: 6, kind: input, shape index: {}]   ;;  %s804_s7 = inlined_call_operand.hbm [shape: f32[6,8], index: 7, kind: output, shape index: {}]  }
   0x1   :  { %13 = vsyncpa [#allocation6], 0 }
   0x2   :  { %14 = vsyncpa [#allocation9], 0 }
   0x3   :  { %15 = vsyncpa [#allocation12], 0 }
   0x4   :  { %16 = vsyncpa [#allocation4], 0  ;;  %s637_s24 = smov [#allocation5]   ;;  %s451_s28 = scalar_lea.hbm %s798_s1, 256 }
   0x5   :  { %s32_s25 = sshll.u32 %s637_s24, 4  ;;  %p452_p0 = scmp.ne.s32.totalorder %s798_s1, %s451_s28  ;;  %s33_s25 = int_to_ptr.vmem [resolvable:$true] %s32_s25 }
   0x6   :  { %p455_p1 = scmp.lt.u32.totalorder %s451_s28, %s798_s1 }
   0x8   :  { %p457_p2 = pnand %p455_p1, %p452_p0 }
   0xa   :  { %460 = shalt.err (!%p457_p2)
}
   0xb   :  { %s461_s10 = scalar_lea.vmem %s33_s25, 256  ;;  %p466_p4 = scmp.lt.s32.totalorder %s33_s25, %s33_s25 }
   0xc   :  { %p462_p3 = scmp.ne.s32.totalorder %s33_s25, %s461_s10  ;;  %p467_p5 = scmp.lt.s32.totalorder %s461_s10, %s461_s10 }
   0xe   :  { %p468_p6 = por %p467_p5, %p466_p4 }
  0x10   :  { %p469_p7 = pnand %p468_p6, %p462_p3 }
  0x12   :  { %472 = shalt.err (!%p469_p7)
}
  0x13   :  { %s638_s11 = smov 64   ;;  %s639_s12 = smov 4  }
  0x14   :  { %38 = dma.hbm_to_vmem [thread:$0]  %s798_s1, 256, %s33_s25, [#allocation6], %s638_s11, %s638_s11, %s639_s12  }
  0x15   :  { %s640_s15 = smov [#allocation8]   ;;  %s641_s17 = smov [#allocation11]  }
  0x16   :  { %s56_s16 = sshll.u32 %s640_s15, 4  ;;  %s81_s18 = sshll.u32 %s641_s17, 4  ;;  %s57_s16 = int_to_ptr.vmem [resolvable:$true] %s56_s16  ;;  %s82_s18 = int_to_ptr.vmem [resolvable:$true] %s81_s18 }
  0x17   :  { %s473_s21 = scalar_lea.hbm %s800_s3, 128 }
  0x18   :  { %p474_p8 = scmp.ne.s32.totalorder %s800_s3, %s473_s21  ;;  %p477_p9 = scmp.lt.u32.totalorder %s473_s21, %s800_s3 }
  0x1a   :  { %p479_p10 = pnand %p477_p9, %p474_p8 }
  0x1c   :  { %482 = shalt.err (!%p479_p10)
}
  0x1d   :  { %s483_s1 = scalar_lea.vmem %s57_s16, 128  ;;  %p488_p12 = scmp.lt.s32.totalorder %s57_s16, %s57_s16 }
  0x1e   :  { %p484_p11 = scmp.ne.s32.totalorder %s57_s16, %s483_s1  ;;  %p489_p13 = scmp.lt.s32.totalorder %s483_s1, %s483_s1 }
  0x20   :  { %p490_p0 = por %p489_p13, %p488_p12 }
  0x22   :  { %p491_p1 = pnand %p490_p0, %p484_p11 }
  0x24   :  { %494 = shalt.err (!%p491_p1)
}
  0x25   :  { %62 = dma.hbm_to_vmem [thread:$0]  %s800_s3, 128, %s57_s16, [#allocation9], %s638_s11, %s638_s11, %s639_s12  }
  0x26   :  { %s495_s30 = scalar_lea.hbm %s802_s5, 64 }
  0x27   :  { %p496_p2 = scmp.ne.s32.totalorder %s802_s5, %s495_s30  ;;  %p499_p3 = scmp.lt.u32.totalorder %s495_s30, %s802_s5 }
  0x29   :  { %p501_p4 = pnand %p499_p3, %p496_p2 }
  0x2b   :  { %504 = shalt.err (!%p501_p4)
}
  0x2c   :  { %s505_s14 = scalar_lea.vmem %s82_s18, 64  ;;  %p510_p6 = scmp.lt.s32.totalorder %s82_s18, %s82_s18 }
  0x2d   :  { %p506_p5 = scmp.ne.s32.totalorder %s82_s18, %s505_s14  ;;  %p511_p7 = scmp.lt.s32.totalorder %s505_s14, %s505_s14 }
  0x2f   :  { %p512_p8 = por %p511_p7, %p510_p6 }
  0x31   :  { %p513_p9 = pnand %p512_p8, %p506_p5 }
  0x33   :  { %516 = shalt.err (!%p513_p9)
}
  0x34   :  { %84 = dma.hbm_to_vmem [thread:$0]  %s802_s5, 64, %s82_s18, [#allocation12]  }
  0x35   :  { %s642_s12 = smov [#allocation2]   ;;  %s643_s16 = smov [#allocation7]  }
  0x36   :  { %s23_s15 = sshll.u32 %s642_s12, 4  ;;  %s44_s17 = sshll.u32 %s643_s16, 4  ;;  %s24_s15 = int_to_ptr.vmem [resolvable:$true] %s23_s15  ;;  %s45_s17 = int_to_ptr.vmem [resolvable:$true] %s44_s17 }
  0x37   :  { %s517_s21 = scalar_lea.hbm %s797_s0, 128 }
  0x38   :  { %p518_p10 = scmp.ne.s32.totalorder %s797_s0, %s517_s21  ;;  %p521_p11 = scmp.lt.u32.totalorder %s517_s21, %s797_s0 }
  0x3a   :  { %p523_p12 = pnand %p521_p11, %p518_p10 }
  0x3c   :  { %526 = shalt.err (!%p523_p12)
}
  0x3d   :  { %s527_s5 = scalar_lea.vmem %s24_s15, 128  ;;  %p532_p0 = scmp.lt.s32.totalorder %s24_s15, %s24_s15 }
  0x3e   :  { %p528_p13 = scmp.ne.s32.totalorder %s24_s15, %s527_s5  ;;  %p533_p1 = scmp.lt.s32.totalorder %s527_s5, %s527_s5 }
  0x40   :  { %p534_p2 = por %p533_p1, %p532_p0 }
  0x42   :  { %p535_p3 = pnand %p534_p2, %p528_p13 }
  0x44   :  { %538 = shalt.err (!%p535_p3)
}
  0x45   :  { %26 = dma.hbm_to_vmem [thread:$0]  %s797_s0, 128, %s24_s15, [#allocation3]  }
  0x46   :  { %s539_s28 = scalar_lea.hbm %s799_s2, 512 }
  0x47   :  { %p540_p4 = scmp.ne.s32.totalorder %s799_s2, %s539_s28  ;;  %p543_p5 = scmp.lt.u32.totalorder %s539_s28, %s799_s2 }
  0x49   :  { %p545_p6 = pnand %p543_p5, %p540_p4 }
  0x4b   :  { %548 = shalt.err (!%p545_p6)
}
  0x4c   :  { %s549_s10 = scalar_lea.vmem %s45_s17, 512  ;;  %p554_p8 = scmp.lt.s32.totalorder %s45_s17, %s45_s17 }
  0x4d   :  { %p550_p7 = scmp.ne.s32.totalorder %s45_s17, %s549_s10  ;;  %p555_p9 = scmp.lt.s32.totalorder %s549_s10, %s549_s10 }
  0x4f   :  { %p556_p10 = por %p555_p9, %p554_p8 }
  0x51   :  { %p557_p11 = pnand %p556_p10, %p550_p7 }
  0x53   :  { %560 = shalt.err (!%p557_p11)
}
  0x54   :  { %s644_s0 = smov 128   ;;  %s645_s13 = smov 8  }
  0x55   :  { %50 = dma.hbm_to_vmem [thread:$0]  %s799_s2, 512, %s45_s17, [#allocation6], %s644_s0, %s644_s0, %s645_s13  }
  0x56   :  { %s646_s11 = smov [#allocation10]   ;;  %s647_s15 = smov [#allocation13]  }
  0x57   :  { %s68_s12 = sshll.u32 %s646_s11, 4  ;;  %s91_s16 = sshll.u32 %s647_s15, 4  ;;  %s69_s12 = int_to_ptr.vmem [resolvable:$true] %s68_s12  ;;  %s92_s16 = int_to_ptr.vmem [resolvable:$true] %s91_s16 }
  0x58   :  { %s561_s21 = scalar_lea.hbm %s801_s4, 256 }
  0x59   :  { %p562_p12 = scmp.ne.s32.totalorder %s801_s4, %s561_s21  ;;  %p565_p13 = scmp.lt.u32.totalorder %s561_s21, %s801_s4 }
  0x5b   :  { %p567_p0 = pnand %p565_p13, %p562_p12 }
  0x5d   :  { %570 = shalt.err (!%p567_p0)
}
  0x5e   :  { %s571_s2 = scalar_lea.vmem %s69_s12, 256  ;;  %p576_p2 = scmp.lt.s32.totalorder %s69_s12, %s69_s12 }
  0x5f   :  { %p572_p1 = scmp.ne.s32.totalorder %s69_s12, %s571_s2  ;;  %p577_p3 = scmp.lt.s32.totalorder %s571_s2, %s571_s2 }
  0x61   :  { %p578_p4 = por %p577_p3, %p576_p2 }
  0x63   :  { %p579_p5 = pnand %p578_p4, %p572_p1 }
  0x65   :  { %582 = shalt.err (!%p579_p5)
}
  0x66   :  { %74 = dma.hbm_to_vmem [thread:$0]  %s801_s4, 256, %s69_s12, [#allocation9], %s644_s0, %s644_s0, %s645_s13  }
  0x67   :  { %s583_s25 = scalar_lea.hbm %s803_s6, 128 }
  0x68   :  { %p584_p6 = scmp.ne.s32.totalorder %s803_s6, %s583_s25  ;;  %p587_p7 = scmp.lt.u32.totalorder %s583_s25, %s803_s6 }
  0x6a   :  { %p589_p8 = pnand %p587_p7, %p584_p6 }
  0x6c   :  { %592 = shalt.err (!%p589_p8)
}
  0x6d   :  { %s593_s8 = scalar_lea.vmem %s92_s16, 128  ;;  %p598_p10 = scmp.lt.s32.totalorder %s92_s16, %s92_s16 }
  0x6e   :  { %p594_p9 = scmp.ne.s32.totalorder %s92_s16, %s593_s8  ;;  %p599_p11 = scmp.lt.s32.totalorder %s593_s8, %s593_s8 }
  0x70   :  { %p600_p12 = por %p599_p11, %p598_p10 }
  0x72   :  { %p601_p13 = pnand %p600_p12, %p594_p9 }
  0x74   :  { %604 = shalt.err (!%p601_p13)
}
  0x75   :  { %94 = dma.hbm_to_vmem [thread:$0]  %s803_s6, 128, %s92_s16, [#allocation12]  }
  0x76   :  { %627 = dma.done.wait [#allocation3], 128  }
  0x77   :  { %628 = vsyncadd [#allocation3], 4294967168 }
  0x78   :  { %629 = dma.done.wait [#allocation6], 768  }
  0x79   :  { %630 = vsyncadd [#allocation6], 4294966528 }
  0x7a   :  { %631 = dma.done.wait [#allocation9], 384  }
  0x7b   :  { %632 = vsyncadd [#allocation9], 4294966912 }
  0x7c   :  { %633 = dma.done.wait [#allocation12], 192  }
  0x7d   :  { %634 = vsyncadd [#allocation12], 4294967104  ;;  %v648_v0 = vmov 0   ;;  %v117_v1 = vld [vmem:[#allocation2] sm:$0xff]  ;;  %vm157_vm0 = vcmask 130048   ;;  %v444_v3 = vld [vmem:[#allocation5] sm:$0xff]  }
  0x7e   :  { %442 = vset.pattern.permute.xlu0 %v648_v0  ;;  %443 = vset.pattern.permute.xlu1 %v648_v0  ;;  %v118_v2 = vpack.c.bf16 %v117_v1, %v117_v1  ;;  %v123_v4 = vld [vmem:[#allocation7] sm:$0xff]  ;;  %v125_v6 = vld [vmem:[#allocation7 + $0x10] sm:$0xff]  ;;  %v124_v7 = vld [vmem:[#allocation7 + $0x8] sm:$0xff]  ;;  %v649_v13 = vmov 0.0   ;;  %vm650_vm1 = vmmov 0   ;;  %vm249_vm6 = vcmask 261120  }
  0x7f   :  { %408 = vmatprep.mubr.msk.bf16.mxu0 %vm157_vm0, %v444_v3  ;;  %129 = vperm.xlu0 %442, %v123_v4   ;;  %v126_v8 = vld [vmem:[#allocation7 + $0x18] sm:$0xff]  ;;  %v232_v10 = vld [vmem:[#allocation10] sm:$0xff]  ;;  %v233_v11 = vld [vmem:[#allocation10 + $0x8] sm:$0xff]  ;;  %vm351_vm9 = vcmask 59392   ;;  %s651_s6 = smov [#allocation14]  }
  0x80   :  { %426 = vmatprep.subr.msk.bf16.mxu0 %vm157_vm0, %v118_v2  ;;  %v165_v5 = vsel %vm157_vm0, %v118_v2, 0  ;;  %139 = vperm.xlu1 %443, %v125_v6   ;;  %v445_v9 = vld [vmem:[#allocation5 + $0x8] sm:$0xff]   ;;  %v446_v36 = vld [vmem:[#allocation8] sm:$0xff]   ;;  %s379_s10 = sshll.u32 %s651_s6, 4  ;;  %s380_s10 = int_to_ptr.vmem [resolvable:$true] %s379_s10 }
  0x81   :  { %407 = vmatpush3.bf16.xpose.msra.mxu0 %v165_v5  ;;  %v302_v12 = vld [vmem:[#allocation13] sm:$0xff]  ;;  %412 = vmatprep.subr.bf16.mxu1 %v649_v13  ;;  %v301_v50 = vld [vmem:[#allocation11] sm:$0xf]  ;;  %s605_s0 = scalar_lea.vmem %s380_s10, 128  ;;  %p610_p1 = scmp.lt.s32.totalorder %s380_s10, %s380_s10 }
  0x82   :  { %420 = vmatprep.subr.bf16.mxu0 %v649_v13  ;;  %416 = vmatprep.mubr.msk.bf16.mxu1 %vm650_vm1, %v649_v13  ;;  %p606_p0 = scmp.ne.s32.totalorder %s380_s10, %s605_s0  ;;  %p611_p2 = scmp.lt.s32.totalorder %s605_s0, %s605_s0 }
  0x83   :  { %134 = vperm.xlu0 %442, %v124_v7  }
  0x84   :  { %144 = vperm.xlu1 %443, %v126_v8   ;;  %p612_p3 = por %p611_p2, %p610_p1 }
  0x86   :  { %p613_p4 = pnand %p612_p3, %p606_p0 }
  0x87   :  { %236 = vperm.xlu0 %442, %v232_v10  }
  0x88   :  { %409 = vmatmul.mubr.msk.bf16.vlgmr.msra.gmra.mrb[0].mxu0 %vm157_vm0, %v445_v9  ;;  %241 = vperm.xlu1 %443, %v233_v11  }
  0x89   :  { %422 = vmatprep.mubr.msk.bf16.mxu0 %vm650_vm1, %v649_v13 }
  0x8b   :  { %305 = vperm.xlu0 %442, %v302_v12  }
  0xfe   :  { %v130_v15 = vpop.permute.xlu0 %129 }
  0xff   :  { %v140_v14 = vpop.permute.xlu1 %139 }
 0x102   :  { %v135_v22 = vpop.permute.xlu0 %134 }
 0x103   :  { %v145_v19 = vpop.permute.xlu1 %144 }
 0x106   :  { %v237_v37 = vpop.permute.xlu0 %236 }
 0x107   :  { %v242_v41 = vpop.permute.xlu1 %241 }
 0x10a   :  { %v306_v51 = vpop.permute.xlu0 %305 }
 0x15b   :  { %v410_v16 = vpop.f32.mrb[0].mxu0 }
 0x15c   :  { %v210_v17 = vadd.f32 %v410_v16, %v140_v14  ;;  %v201_v18 = vpop.f32.mrb[1].mxu0 }
 0x15d   :  { %v202_v20 = vadd.f32 %v201_v18, %v130_v15  ;;  %v411_v21 = vpop.f32.mrb[2].mxu0 }
 0x15e   :  { %v222_v23 = vmul.f32 0.01, %v210_v17  ;;  %v213_v24 = vadd.f32 %v411_v21, %v145_v19  ;;  %v204_v25 = vpop.f32.mrb[3].mxu0  ;;  %vm218_vm2 = vcmp.ge.f32.partialorder %v210_v17, 0.0 }
 0x15f   :  { %v220_v26 = vmul.f32 0.01, %v202_v20  ;;  %v205_v27 = vadd.f32 %v204_v25, %v135_v22  ;;  %vm216_vm4 = vcmp.ge.f32.partialorder %v202_v20, 0.0 }
 0x160   :  { %vm219_vm3 = vcmp.ge.f32.partialorder %v213_v24, 0.0  ;;  %v223_v28 = vmul.f32 0.01, %v213_v24  ;;  %v226_v30 = vsel %vm218_vm2, %v210_v17, %v222_v23 }
 0x161   :  { %v221_v29 = vmul.f32 0.01, %v205_v27  ;;  %vm217_vm5 = vcmp.ge.f32.partialorder %v205_v27, 0.0  ;;  %v224_v32 = vsel %vm216_vm4, %v202_v20, %v220_v26 }
 0x162   :  { %v227_v31 = vsel %vm219_vm3, %v213_v24, %v223_v28 }
 0x163   :  { %v225_v33 = vsel %vm217_vm5, %v205_v27, %v221_v29  ;;  %v229_v34 = vpack.c.bf16 %v227_v31, %v226_v30 }
 0x164   :  { %v228_v35 = vpack.c.bf16 %v225_v33, %v224_v32 }
 0x166   :  { %413 = vmatpush3.bf16.msra.mxu1 %v228_v35 }
 0x167   :  { %414 = vmatprep.subr.bf16.mxu1 %v649_v13 }
 0x16a   :  { %415 = vmatpush3.bf16.msra.mxu1 %v229_v34 }
 0x16d   :  { %417 = vmatmul.mubr.msk.bf16.vlgmr.msra.gmra.mrb[0].mxu1 %vm249_vm6, %v446_v36 }
 0x240   :  { %v287_v38 = vpop.f32.mrb[0].mxu1 }
 0x241   :  { %v288_v39 = vadd.f32 %v287_v38, %v237_v37  ;;  %v418_v40 = vpop.f32.mrb[1].mxu1 }
 0x242   :  { %v290_v42 = vpop.f32.mrb[2].mxu1 }
 0x243   :  { %v296_v43 = vmul.f32 0.01, %v288_v39  ;;  %v291_v44 = vadd.f32 %v290_v42, %v242_v41  ;;  %v419_v45 = vpop.f32.mrb[3].mxu1  ;;  %vm294_vm7 = vcmp.ge.f32.partialorder %v288_v39, 0.0 }
 0x245   :  { %vm295_vm8 = vcmp.ge.f32.partialorder %v291_v44, 0.0  ;;  %v297_v46 = vmul.f32 0.01, %v291_v44  ;;  %v298_v47 = vsel %vm294_vm7, %v288_v39, %v296_v43 }
 0x247   :  { %v299_v48 = vsel %vm295_vm8, %v291_v44, %v297_v46 }
 0x248   :  { %v300_v49 = vpack.c.bf16 %v299_v48, %v298_v47 }
 0x24a   :  { %421 = vmatpush3.bf16.msra.mxu0 %v300_v49 }
 0x24d   :  { %423 = vmatmul.mubr.msk.bf16.vlgmr.msra.gmra.mrb[4].mxu0 %vm157_vm0, %v301_v50 }
 0x320   :  { %v345_v52 = vpop.f32.mrb[4].mxu0 }
 0x321   :  { %v346_v53 = vadd.f32 %v345_v52, %v306_v51  ;;  %v424_v54 = vpop.f32.mrb[5].mxu0 }
 0x322   :  { %v348_v55 = vpop.f32.mrb[6].mxu0 }
 0x323   :  { %v352_v56 = vsel %vm351_vm9, %v346_v53, -inf  ;;  %371 = vst.msk [vmem:[#allocation14] sm:$0x7] %vm351_vm9, %v346_v53  ;;  %v425_v57 = vpop.f32.mrb[7].mxu0 }
 0x324   :  { %v353_v58 = vrot.slane %v352_v56, 4 }
 0x326   :  { %v354_v59 = vmax.f32 %v352_v56, %v353_v58 }
 0x328   :  { %v355_v60 = vrot.slane %v354_v59, 2 }
 0x32a   :  { %v356_v61 = vmax.f32 %v354_v59, %v355_v60 }
 0x32c   :  { %v357_v62 = vrot.slane %v356_v61, 1 }
 0x32e   :  { %v358_v63 = vmax.f32 %v356_v61, %v357_v62 }
 0x330   :  { %v359_v0 = vsub.f32 %v346_v53, %v358_v63 }
 0x332   :  { %v360_v1 = vmul.f32 1.442695, %v359_v0 }
 0x334   :  { %447 = vpow2.f32 %v360_v1 }
 0x33e   :  { %v448_v2 = vpop.eup %447 }
 0x33f   :  { %v362_v3 = vsel %vm351_vm9, %v448_v2, 0.0 }
 0x340   :  { %v363_v4 = vrot.slane %v362_v3, 4 }
 0x342   :  { %v364_v5 = vadd.f32 %v363_v4, %v362_v3 }
 0x344   :  { %v365_v6 = vrot.slane %v364_v5, 2 }
 0x346   :  { %v366_v7 = vadd.f32 %v365_v6, %v364_v5 }
 0x348   :  { %v367_v8 = vrot.slane %v366_v7, 1 }
 0x34a   :  { %v368_v9 = vadd.f32 %v367_v8, %v366_v7 }
 0x34c   :  { %449 = vrcp.f32 %v368_v9 }
 0x356   :  { %v450_v10 = vpop.eup %449 }
 0x357   :  { %v370_v11 = vmul.f32 %v450_v10, %v448_v2 }
 0x359   :  { %372 = vst.msk [vmem:[#allocation14 + $0x3] sm:$0x7] %vm351_vm9, %v370_v11 }
 0x35a   :  { %616 = shalt.err (!%p613_p4)
}
 0x35b   :  { %s617_s3 = scalar_lea.hbm %s804_s7, 128 }
 0x35c   :  { %p618_p5 = scmp.ne.s32.totalorder %s804_s7, %s617_s3  ;;  %p621_p6 = scmp.lt.u32.totalorder %s617_s3, %s804_s7 }
 0x35e   :  { %p623_p7 = pnand %p621_p6, %p618_p5 }
 0x360   :  { %626 = shalt.err (!%p623_p7)
}
 0x361   :  { %382 = dma.vmem_to_hbm [thread:$0]  %s380_s10, 128, %s804_s7, [#allocation4]  }
 0x362   :  { %635 = dma.done.wait [#allocation4], 128  }
 0x363   :  { %636 = vsyncadd [#allocation4], 4294967168 }
 0x364   :  { %386 = vsyncpa [#allocation3], 1 }
 0x365   :  { %387 = vsyncpa [#allocation6], 1 }
 0x366   :  { %388 = vsyncpa [#allocation9], 1 }
 0x367   :  { %389 = vsyncpa [#allocation12], 1 }
 0x368   :  { %390 = vsyncpa [#allocation4], 1 }

</bundles_post_ra>
